<compile_context>
chip_gen: v6e
topology: v6e:2x2x1
jax: 0.10.0
libtpu: 0.0.40
codegen_flags: <defaults>
</compile_context>

<pallas_src>
import math

import jax
import jax.numpy as jnp
from jax import lax
from jax.experimental import pallas as pl
from jax.experimental.pallas import tpu as pltpu

EPS = 1e-5


def _make_kernel(Cin, Cout, Ho, Wo):
    hw = Ho * Wo

    def kernel(lhs_ref, mask_ref, w1_ref, wds_ref, dw2_ref, w2_ref, o_ref):
        # lhs_ref : (9*Cin, hw) bf16  im2col of ONE image (tap-major / channel-minor rows)
        # mask_ref: (9, hw)     f32   boundary masks for the 3x3 stride-1 conv taps
        # w1_ref  : (Cout, 9*Cin) bf16 fused dconv1 (*) pconv1
        # wds_ref : (Cout, Cin)  bf16  downsample 1x1-stride-2 weights (center tap only)
        # dw2_ref : (Cout, 9)    f32   depthwise conv2 weights, tap on minor axis
        # w2_ref  : (Cout, Cout) bf16  pconv2 weights, transposed to (out, in)
        # o_ref   : (Cout, hw)   f32   output slab for this image

        lhs = lhs_ref[...]

        # ---- fused dconv1 + pconv1 (MXU, bf16 in / f32 acc) ----
        t1 = jnp.dot(w1_ref[...], lhs, preferred_element_type=jnp.float32)

        # ---- residual downsample: small separate matmul on the center-tap rows ----
        ident = jnp.dot(wds_ref[...], lhs[4 * Cin:5 * Cin, :],
                        preferred_element_type=jnp.float32)

        def inorm(x):
            # Per-image InstanceNorm: plain lane reductions (XLU) + broadcast, all f32,
            # two-pass (centered) variance.
            mu = jnp.sum(x, axis=-1, keepdims=True) * (1.0 / hw)
            xc = x - mu
            var = jnp.sum(xc * xc, axis=-1, keepdims=True) * (1.0 / hw)
            return xc * lax.rsqrt(var + EPS)

        # ---- InstanceNorm #1 + ReLU ----
        y1 = jnp.maximum(inorm(t1), 0.0)

        # ---- depthwise 3x3 stride-1 pad-1 conv: XLU rolls + precomputed f32 masks ----
        dw2 = dw2_ref[...]
        mask = mask_ref[...]
        acc2 = jnp.zeros((Cout, hw), jnp.float32)
        for k in range(9):
            dh, dwd = k // 3 - 1, k % 3 - 1
            d = dh * Wo + dwd                       # shifted[:, s] == y1[:, s + d]
            shifted = y1 if d == 0 else pltpu.roll(y1, shift=(-d) % hw, axis=1)
            acc2 = acc2 + dw2[:, k:k + 1] * (mask[k:k + 1, :] * shifted)

        # ---- pconv2 (MXU, bf16 in / f32 acc) + InstanceNorm #2 + residual add ----
        t2 = jnp.dot(w2_ref[...], acc2.astype(jnp.bfloat16),
                     preferred_element_type=jnp.float32)
        o_ref[...] = inorm(t2) + ident

    return kernel


def separable_residual_down_block(x_nchw, params):
    """x_nchw: (N, Cin, H, W) float32. Returns (N, Cout, H//2, W//2) float32."""
    dw1, pw1, dw2, pw2, wds = params
    x = x_nchw.astype(jnp.float32)
    N, Cin, H, W = x.shape
    Cout = pw1.shape[1]
    Ho, Wo = (H - 1) // 2 + 1, (W - 1) // 2 + 1
    hw = Ho * Wo

    # --- glue: stride-2 3x3 im2col straight into the per-image fused-matmul LHS layout ---
    # (NCHW is already batch-major / channel-before-spatial, so no extra transpose needed.)
    xp = jnp.pad(x, ((0, 0), (0, 0), (1, 1), (1, 1)))
    taps = [xp[:, :, kh:kh + 2 * Ho:2, kw:kw + 2 * Wo:2]          # 9 x (N, Cin, Ho, Wo)
            for kh in range(3) for kw in range(3)]
    lhs = (jnp.stack(taps, axis=1)                                # (N, 9, Cin, Ho, Wo)
           .reshape(N, 9 * Cin, hw)
           .astype(jnp.bfloat16))                                 # bf16 halves LHS HBM bytes

    # --- fused / transposed weights (tiny, one-time) ---
    wf = (dw1.reshape(9, Cin)[:, :, None] * pw1[None, :, :]).reshape(9 * Cin, Cout)
    w1 = wf.T.astype(jnp.bfloat16)                                # (Cout, 9*Cin)
    wds_t = wds.T.astype(jnp.bfloat16)                            # (Cout, Cin)
    dw2_t = dw2.reshape(9, Cout).T.astype(jnp.float32)            # (Cout, 9)  (VPU, keep f32)
    w2_t = pw2.T.astype(jnp.bfloat16)                             # (Cout, Cout)

    # --- precomputed boundary masks for the 9 dconv2 taps: (9, hw) f32 ---
    sidx = jnp.arange(hw, dtype=jnp.int32)
    ii, jj = sidx // Wo, sidx % Wo
    mask9 = jnp.stack(
        [((ii + (kh - 1) >= 0) & (ii + (kh - 1) < Ho)
          & (jj + (kw - 1) >= 0) & (jj + (kw - 1) < Wo))
         for kh in range(3) for kw in range(3)],
        axis=0).astype(jnp.float32)

    kernel = _make_kernel(Cin, Cout, Ho, Wo)
    out = pl.pallas_call(
        kernel,
        out_shape=jax.ShapeDtypeStruct((N, Cout, hw), jnp.float32),
        grid=(N,),
        in_specs=[
            pl.BlockSpec((pl.Squeezed(), 9 * Cin, hw), lambda b: (b, 0, 0)),  # per-image LHS
            pl.BlockSpec((9, hw), lambda b: (0, 0)),                          # tap masks
            pl.BlockSpec((Cout, 9 * Cin), lambda b: (0, 0)),                  # fused W1
            pl.BlockSpec((Cout, Cin), lambda b: (0, 0)),                      # downsample W
            pl.BlockSpec((Cout, 9), lambda b: (0, 0)),                        # dconv2 W
            pl.BlockSpec((Cout, Cout), lambda b: (0, 0)),                     # pconv2 W
        ],
        out_specs=pl.BlockSpec((pl.Squeezed(), Cout, hw), lambda b: (b, 0, 0)),
        compiler_params=pltpu.CompilerParams(
            dimension_semantics=("parallel",),       # shards images across v7x's 2 TCs
            # Explicit scoped-VMEM limit (v5e default is only 16 MiB); re-derive per tile
            # size when scaling up (v7x has 64 MiB physical — leave headroom).
            vmem_limit_bytes=32 * 1024 * 1024,
        ),
    )(lhs, mask9, w1, wds_t, dw2_t, w2_t)

    return out.reshape(N, Cout, Ho, Wo)              # free reshape — already NCHW


def _reference(x_nchw, params):
    """Pure-JAX f32 reference mirroring the PyTorch forward (for validation)."""
    dw1, pw1, dw2, pw2, wds = params
    x = jnp.transpose(x_nchw, (0, 2, 3, 1)).astype(jnp.float32)
    Cin, Cout = pw1.shape
    dn = ("NHWC", "HWIO", "NHWC")
    hi = lax.Precision.HIGHEST
    d1 = lax.conv_general_dilated(x, dw1.reshape(3, 3, 1, Cin), (2, 2),
                                  ((1, 1), (1, 1)), dimension_numbers=dn,
                                  feature_group_count=Cin, precision=hi)
    p1 = lax.conv_general_dilated(d1, pw1.reshape(1, 1, Cin, Cout), (1, 1),
                                  "VALID", dimension_numbers=dn, precision=hi)
    mu = p1.mean(axis=(1, 2), keepdims=True)
    var = ((p1 - mu) ** 2).mean(axis=(1, 2), keepdims=True)
    y = jnp.maximum((p1 - mu) * lax.rsqrt(var + EPS), 0.0)
    d2 = lax.conv_general_dilated(y, dw2.reshape(3, 3, 1, Cout), (1, 1),
                                  ((1, 1), (1, 1)), dimension_numbers=dn,
                                  feature_group_count=Cout, precision=hi)
    p2 = lax.conv_general_dilated(d2, pw2.reshape(1, 1, Cout, Cout), (1, 1),
                                  "VALID", dimension_numbers=dn, precision=hi)
    mu2 = p2.mean(axis=(1, 2), keepdims=True)
    var2 = ((p2 - mu2) ** 2).mean(axis=(1, 2), keepdims=True)
    y2 = (p2 - mu2) * lax.rsqrt(var2 + EPS)
    ident = lax.conv_general_dilated(x, wds.reshape(1, 1, Cin, Cout), (2, 2),
                                     "VALID", dimension_numbers=dn, precision=hi)
    return jnp.transpose(y2 + ident, (0, 3, 1, 2))


if __name__ == "__main__":
    import numpy as np

    # Small demo shape: batch 4 -> grid of 4 pipelined / megacore-parallel steps,
    # spatial 32 -> hw = 256 output lanes per step (lane-dense, 128-aligned).
    N, Cin, Cout, H, W = 4, 4, 8, 32, 32
    key = jax.random.PRNGKey(0)
    kx, k1, k2, k3, k4, k5 = jax.random.split(key, 6)

    x = jax.random.normal(kx, (N, Cin, H, W), jnp.float32)        # NCHW, PyTorch-style

    # Deterministic synthetic parameters (shapes per nn.Module __init__, all bias-free).
    params = (
        jax.random.normal(k1, (3, 3, Cin), jnp.float32) / 3.0,               # dconv1 (depthwise)
        jax.random.normal(k2, (Cin, Cout), jnp.float32) / math.sqrt(Cin),    # pconv1
        jax.random.normal(k3, (3, 3, Cout), jnp.float32) / 3.0,              # dconv2 (depthwise)
        jax.random.normal(k4, (Cout, Cout), jnp.float32) / math.sqrt(Cout),  # pconv2
        jax.random.normal(k5, (Cin, Cout), jnp.float32) / math.sqrt(Cin),    # downsample
    )

    out = jax.block_until_ready(separable_residual_down_block(x, params))
    ref = jax.block_until_ready(_reference(x, params))

    assert out.shape == (N, Cout, H // 2, W // 2), out.shape
    # Tolerance sized for bf16 MXU operands (reference is f32/HIGHEST).
    np.testing.assert_allclose(np.asarray(out), np.asarray(ref), rtol=5e-2, atol=5e-2)
    print("KERNEL_OK")
</pallas_src>

<mosaic_0001>
module attributes {stable_mosaic.version = 11 : i64} {
  func.func @kernel(%arg0: i32, %arg1: memref<1x36x256xbf16, #tpu.memory_space<vmem>>, %arg2: memref<9x256xf32, #tpu.memory_space<vmem>>, %arg3: memref<8x36xbf16, #tpu.memory_space<vmem>>, %arg4: memref<8x4xbf16, #tpu.memory_space<vmem>>, %arg5: memref<8x9xf32, #tpu.memory_space<vmem>>, %arg6: memref<8x8xbf16, #tpu.memory_space<vmem>>, %arg7: memref<1x8x256xf32, #tpu.memory_space<vmem>>) attributes {dimension_semantics = [#tpu.dimension_semantics<parallel>], iteration_bounds = array<i64: 4>, scalar_prefetch = 0 : i64, scratch_operands = 0 : i64, tpu.core_type = #tpu.core_type<tc>, window_params = [{transform_indices = @transform_0, window_bounds = array<i64: 1, 36, 256>}, {pipeline_mode = #tpu.pipeline_mode<synchronous>, transform_indices = @transform_1, window_bounds = array<i64: 9, 256>}, {pipeline_mode = #tpu.pipeline_mode<synchronous>, transform_indices = @transform_2, window_bounds = array<i64: 8, 36>}, {pipeline_mode = #tpu.pipeline_mode<synchronous>, transform_indices = @transform_3, window_bounds = array<i64: 8, 4>}, {pipeline_mode = #tpu.pipeline_mode<synchronous>, transform_indices = @transform_4, window_bounds = array<i64: 8, 9>}, {pipeline_mode = #tpu.pipeline_mode<synchronous>, transform_indices = @transform_5, window_bounds = array<i64: 8, 8>}, {transform_indices = @transform_6, window_bounds = array<i64: 1, 8, 256>}]} {
    %c0 = arith.constant 0 : index
    %c0_0 = arith.constant 0 : index
    %c0_1 = arith.constant 0 : index
    %0 = vector.load %arg1[%c0, %c0_0, %c0_1] : memref<1x36x256xbf16, #tpu.memory_space<vmem>>, vector<1x36x256xbf16>
    %1 = vector.shape_cast %0 : vector<1x36x256xbf16> to vector<36x256xbf16>
    %c0_2 = arith.constant 0 : index
    %c0_3 = arith.constant 0 : index
    %2 = vector.load %arg3[%c0_2, %c0_3] : memref<8x36xbf16, #tpu.memory_space<vmem>>, vector<8x36xbf16>
    %cst = arith.constant dense<0.000000e+00> : vector<8x256xf32>
    %3 = tpu.matmul %2, %1, %cst {dimension_numbers = #tpu.dot_dimension_numbers<[1], [0], [0], [1], [0, 0, 1, 1], [], []>} : vector<8x36xbf16>, vector<36x256xbf16>, vector<8x256xf32> -> vector<8x256xf32>
    %c0_4 = arith.constant 0 : index
    %c0_5 = arith.constant 0 : index
    %4 = vector.load %arg4[%c0_4, %c0_5] : memref<8x4xbf16, #tpu.memory_space<vmem>>, vector<8x4xbf16>
    %5 = vector.extract_strided_slice %1 {offsets = [16, 0], sizes = [4, 256], strides = [1, 1]} : vector<36x256xbf16> to vector<4x256xbf16>
    %cst_6 = arith.constant dense<0.000000e+00> : vector<8x256xf32>
    %6 = tpu.matmul %4, %5, %cst_6 {dimension_numbers = #tpu.dot_dimension_numbers<[1], [0], [0], [1], [0, 0, 1, 1], [], []>} : vector<8x4xbf16>, vector<4x256xbf16>, vector<8x256xf32> -> vector<8x256xf32>
    %cst_7 = arith.constant dense<0.000000e+00> : vector<8xf32>
    %7 = vector.multi_reduction <add>, %3, %cst_7 [1] : vector<8x256xf32> to vector<8xf32>
    %8 = vector.shape_cast %7 : vector<8xf32> to vector<8x1xf32>
    %cst_8 = arith.constant 3.906250e-03 : f32
    %9 = vector.broadcast %cst_8 : f32 to vector<8x1xf32>
    %10 = arith.mulf %8, %9 : vector<8x1xf32>
    %11 = vector.broadcast %10 : vector<8x1xf32> to vector<8x256xf32>
    %12 = arith.subf %3, %11 : vector<8x256xf32>
    %13 = arith.mulf %12, %12 : vector<8x256xf32>
    %cst_9 = arith.constant dense<0.000000e+00> : vector<8xf32>
    %14 = vector.multi_reduction <add>, %13, %cst_9 [1] : vector<8x256xf32> to vector<8xf32>
    %15 = vector.shape_cast %14 : vector<8xf32> to vector<8x1xf32>
    %cst_10 = arith.constant 3.906250e-03 : f32
    %16 = vector.broadcast %cst_10 : f32 to vector<8x1xf32>
    %17 = arith.mulf %15, %16 : vector<8x1xf32>
    %cst_11 = arith.constant 9.99999974E-6 : f32
    %18 = vector.broadcast %cst_11 : f32 to vector<8x1xf32>
    %19 = arith.addf %17, %18 : vector<8x1xf32>
    %20 = math.rsqrt %19 : vector<8x1xf32>
    %21 = vector.broadcast %20 : vector<8x1xf32> to vector<8x256xf32>
    %22 = arith.mulf %12, %21 : vector<8x256xf32>
    %cst_12 = arith.constant 0.000000e+00 : f32
    %23 = vector.broadcast %cst_12 : f32 to vector<8x256xf32>
    %24 = arith.maximumf %22, %23 : vector<8x256xf32>
    %c0_13 = arith.constant 0 : index
    %c0_14 = arith.constant 0 : index
    %25 = vector.load %arg5[%c0_13, %c0_14] : memref<8x9xf32, #tpu.memory_space<vmem>>, vector<8x9xf32>
    %c0_15 = arith.constant 0 : index
    %c0_16 = arith.constant 0 : index
    %26 = vector.load %arg2[%c0_15, %c0_16] : memref<9x256xf32, #tpu.memory_space<vmem>>, vector<9x256xf32>
    %cst_17 = arith.constant 0.000000e+00 : f32
    %27 = vector.broadcast %cst_17 : f32 to vector<8x256xf32>
    %c17_i32 = arith.constant 17 : i32
    %28 = tpu.dynamic_rotate %24 by %c17_i32 dim 1 : vector<8x256xf32>, i32 -> vector<8x256xf32>
    %29 = vector.extract_strided_slice %25 {offsets = [0, 0], sizes = [8, 1], strides = [1, 1]} : vector<8x9xf32> to vector<8x1xf32>
    %30 = vector.extract_strided_slice %26 {offsets = [0, 0], sizes = [1, 256], strides = [1, 1]} : vector<9x256xf32> to vector<1x256xf32>
    %31 = vector.broadcast %30 : vector<1x256xf32> to vector<8x256xf32>
    %32 = arith.mulf %31, %28 : vector<8x256xf32>
    %33 = vector.broadcast %29 : vector<8x1xf32> to vector<8x256xf32>
    %34 = arith.mulf %33, %32 : vector<8x256xf32>
    %35 = arith.addf %27, %34 : vector<8x256xf32>
    %c16_i32 = arith.constant 16 : i32
    %36 = tpu.dynamic_rotate %24 by %c16_i32 dim 1 : vector<8x256xf32>, i32 -> vector<8x256xf32>
    %37 = vector.extract_strided_slice %25 {offsets = [0, 1], sizes = [8, 1], strides = [1, 1]} : vector<8x9xf32> to vector<8x1xf32>
    %38 = vector.extract_strided_slice %26 {offsets = [1, 0], sizes = [1, 256], strides = [1, 1]} : vector<9x256xf32> to vector<1x256xf32>
    %39 = vector.broadcast %38 : vector<1x256xf32> to vector<8x256xf32>
    %40 = arith.mulf %39, %36 : vector<8x256xf32>
    %41 = vector.broadcast %37 : vector<8x1xf32> to vector<8x256xf32>
    %42 = arith.mulf %41, %40 : vector<8x256xf32>
    %43 = arith.addf %35, %42 : vector<8x256xf32>
    %c15_i32 = arith.constant 15 : i32
    %44 = tpu.dynamic_rotate %24 by %c15_i32 dim 1 : vector<8x256xf32>, i32 -> vector<8x256xf32>
    %45 = vector.extract_strided_slice %25 {offsets = [0, 2], sizes = [8, 1], strides = [1, 1]} : vector<8x9xf32> to vector<8x1xf32>
    %46 = vector.extract_strided_slice %26 {offsets = [2, 0], sizes = [1, 256], strides = [1, 1]} : vector<9x256xf32> to vector<1x256xf32>
    %47 = vector.broadcast %46 : vector<1x256xf32> to vector<8x256xf32>
    %48 = arith.mulf %47, %44 : vector<8x256xf32>
    %49 = vector.broadcast %45 : vector<8x1xf32> to vector<8x256xf32>
    %50 = arith.mulf %49, %48 : vector<8x256xf32>
    %51 = arith.addf %43, %50 : vector<8x256xf32>
    %c1_i32 = arith.constant 1 : i32
    %52 = tpu.dynamic_rotate %24 by %c1_i32 dim 1 : vector<8x256xf32>, i32 -> vector<8x256xf32>
    %53 = vector.extract_strided_slice %25 {offsets = [0, 3], sizes = [8, 1], strides = [1, 1]} : vector<8x9xf32> to vector<8x1xf32>
    %54 = vector.extract_strided_slice %26 {offsets = [3, 0], sizes = [1, 256], strides = [1, 1]} : vector<9x256xf32> to vector<1x256xf32>
    %55 = vector.broadcast %54 : vector<1x256xf32> to vector<8x256xf32>
    %56 = arith.mulf %55, %52 : vector<8x256xf32>
    %57 = vector.broadcast %53 : vector<8x1xf32> to vector<8x256xf32>
    %58 = arith.mulf %57, %56 : vector<8x256xf32>
    %59 = arith.addf %51, %58 : vector<8x256xf32>
    %60 = vector.extract_strided_slice %25 {offsets = [0, 4], sizes = [8, 1], strides = [1, 1]} : vector<8x9xf32> to vector<8x1xf32>
    %61 = vector.extract_strided_slice %26 {offsets = [4, 0], sizes = [1, 256], strides = [1, 1]} : vector<9x256xf32> to vector<1x256xf32>
    %62 = vector.broadcast %61 : vector<1x256xf32> to vector<8x256xf32>
    %63 = arith.mulf %62, %24 : vector<8x256xf32>
    %64 = vector.broadcast %60 : vector<8x1xf32> to vector<8x256xf32>
    %65 = arith.mulf %64, %63 : vector<8x256xf32>
    %66 = arith.addf %59, %65 : vector<8x256xf32>
    %c255_i32 = arith.constant 255 : i32
    %67 = tpu.dynamic_rotate %24 by %c255_i32 dim 1 : vector<8x256xf32>, i32 -> vector<8x256xf32>
    %68 = vector.extract_strided_slice %25 {offsets = [0, 5], sizes = [8, 1], strides = [1, 1]} : vector<8x9xf32> to vector<8x1xf32>
    %69 = vector.extract_strided_slice %26 {offsets = [5, 0], sizes = [1, 256], strides = [1, 1]} : vector<9x256xf32> to vector<1x256xf32>
    %70 = vector.broadcast %69 : vector<1x256xf32> to vector<8x256xf32>
    %71 = arith.mulf %70, %67 : vector<8x256xf32>
    %72 = vector.broadcast %68 : vector<8x1xf32> to vector<8x256xf32>
    %73 = arith.mulf %72, %71 : vector<8x256xf32>
    %74 = arith.addf %66, %73 : vector<8x256xf32>
    %c241_i32 = arith.constant 241 : i32
    %75 = tpu.dynamic_rotate %24 by %c241_i32 dim 1 : vector<8x256xf32>, i32 -> vector<8x256xf32>
    %76 = vector.extract_strided_slice %25 {offsets = [0, 6], sizes = [8, 1], strides = [1, 1]} : vector<8x9xf32> to vector<8x1xf32>
    %77 = vector.extract_strided_slice %26 {offsets = [6, 0], sizes = [1, 256], strides = [1, 1]} : vector<9x256xf32> to vector<1x256xf32>
    %78 = vector.broadcast %77 : vector<1x256xf32> to vector<8x256xf32>
    %79 = arith.mulf %78, %75 : vector<8x256xf32>
    %80 = vector.broadcast %76 : vector<8x1xf32> to vector<8x256xf32>
    %81 = arith.mulf %80, %79 : vector<8x256xf32>
    %82 = arith.addf %74, %81 : vector<8x256xf32>
    %c240_i32 = arith.constant 240 : i32
    %83 = tpu.dynamic_rotate %24 by %c240_i32 dim 1 : vector<8x256xf32>, i32 -> vector<8x256xf32>
    %84 = vector.extract_strided_slice %25 {offsets = [0, 7], sizes = [8, 1], strides = [1, 1]} : vector<8x9xf32> to vector<8x1xf32>
    %85 = vector.extract_strided_slice %26 {offsets = [7, 0], sizes = [1, 256], strides = [1, 1]} : vector<9x256xf32> to vector<1x256xf32>
    %86 = vector.broadcast %85 : vector<1x256xf32> to vector<8x256xf32>
    %87 = arith.mulf %86, %83 : vector<8x256xf32>
    %88 = vector.broadcast %84 : vector<8x1xf32> to vector<8x256xf32>
    %89 = arith.mulf %88, %87 : vector<8x256xf32>
    %90 = arith.addf %82, %89 : vector<8x256xf32>
    %c239_i32 = arith.constant 239 : i32
    %91 = tpu.dynamic_rotate %24 by %c239_i32 dim 1 : vector<8x256xf32>, i32 -> vector<8x256xf32>
    %92 = vector.extract_strided_slice %25 {offsets = [0, 8], sizes = [8, 1], strides = [1, 1]} : vector<8x9xf32> to vector<8x1xf32>
    %93 = vector.extract_strided_slice %26 {offsets = [8, 0], sizes = [1, 256], strides = [1, 1]} : vector<9x256xf32> to vector<1x256xf32>
    %94 = vector.broadcast %93 : vector<1x256xf32> to vector<8x256xf32>
    %95 = arith.mulf %94, %91 : vector<8x256xf32>
    %96 = vector.broadcast %92 : vector<8x1xf32> to vector<8x256xf32>
    %97 = arith.mulf %96, %95 : vector<8x256xf32>
    %98 = arith.addf %90, %97 : vector<8x256xf32>
    %c0_18 = arith.constant 0 : index
    %c0_19 = arith.constant 0 : index
    %99 = vector.load %arg6[%c0_18, %c0_19] : memref<8x8xbf16, #tpu.memory_space<vmem>>, vector<8x8xbf16>
    %100 = arith.truncf %98 : vector<8x256xf32> to vector<8x256xbf16>
    %cst_20 = arith.constant dense<0.000000e+00> : vector<8x256xf32>
    %101 = tpu.matmul %99, %100, %cst_20 {dimension_numbers = #tpu.dot_dimension_numbers<[1], [0], [0], [1], [0, 0, 1, 1], [], []>} : vector<8x8xbf16>, vector<8x256xbf16>, vector<8x256xf32> -> vector<8x256xf32>
    %cst_21 = arith.constant dense<0.000000e+00> : vector<8xf32>
    %102 = vector.multi_reduction <add>, %101, %cst_21 [1] : vector<8x256xf32> to vector<8xf32>
    %103 = vector.shape_cast %102 : vector<8xf32> to vector<8x1xf32>
    %cst_22 = arith.constant 3.906250e-03 : f32
    %104 = vector.broadcast %cst_22 : f32 to vector<8x1xf32>
    %105 = arith.mulf %103, %104 : vector<8x1xf32>
    %106 = vector.broadcast %105 : vector<8x1xf32> to vector<8x256xf32>
    %107 = arith.subf %101, %106 : vector<8x256xf32>
    %108 = arith.mulf %107, %107 : vector<8x256xf32>
    %cst_23 = arith.constant dense<0.000000e+00> : vector<8xf32>
    %109 = vector.multi_reduction <add>, %108, %cst_23 [1] : vector<8x256xf32> to vector<8xf32>
    %110 = vector.shape_cast %109 : vector<8xf32> to vector<8x1xf32>
    %cst_24 = arith.constant 3.906250e-03 : f32
    %111 = vector.broadcast %cst_24 : f32 to vector<8x1xf32>
    %112 = arith.mulf %110, %111 : vector<8x1xf32>
    %cst_25 = arith.constant 9.99999974E-6 : f32
    %113 = vector.broadcast %cst_25 : f32 to vector<8x1xf32>
    %114 = arith.addf %112, %113 : vector<8x1xf32>
    %115 = math.rsqrt %114 : vector<8x1xf32>
    %116 = vector.broadcast %115 : vector<8x1xf32> to vector<8x256xf32>
    %117 = arith.mulf %107, %116 : vector<8x256xf32>
    %118 = arith.addf %117, %6 : vector<8x256xf32>
    %c0_26 = arith.constant 0 : index
    %c0_27 = arith.constant 0 : index
    %c0_28 = arith.constant 0 : index
    %119 = vector.load %arg7[%c0_26, %c0_27, %c0_28] : memref<1x8x256xf32, #tpu.memory_space<vmem>>, vector<1x8x256xf32>
    %120 = vector.shape_cast %119 : vector<1x8x256xf32> to vector<8x256xf32>
    %121 = vector.shape_cast %118 : vector<8x256xf32> to vector<1x8x256xf32>
    tpu.vector_store %arg7[%c0_26, %c0_27, %c0_28], %121 {strides = array<i32>} : memref<1x8x256xf32, #tpu.memory_space<vmem>>, vector<1x8x256xf32>,
    return
  }
  func.func @transform_0(%arg0: i32) -> (i32, i32, i32) {
    %c0_i32 = arith.constant 0 : i32
    %c0_i32_0 = arith.constant 0 : i32
    %c0_i32_1 = arith.constant 0 : i32
    return %arg0, %c0_i32, %c0_i32_0 : i32, i32, i32
  }
  func.func @transform_1(%arg0: i32) -> (i32, i32) {
    %c0_i32 = arith.constant 0 : i32
    %c0_i32_0 = arith.constant 0 : i32
    %c0_i32_1 = arith.constant 0 : i32
    return %c0_i32, %c0_i32_0 : i32, i32
  }
  func.func @transform_2(%arg0: i32) -> (i32, i32) {
    %c0_i32 = arith.constant 0 : i32
    %c0_i32_0 = arith.constant 0 : i32
    %c0_i32_1 = arith.constant 0 : i32
    return %c0_i32, %c0_i32_0 : i32, i32
  }
  func.func @transform_3(%arg0: i32) -> (i32, i32) {
    %c0_i32 = arith.constant 0 : i32
    %c0_i32_0 = arith.constant 0 : i32
    %c0_i32_1 = arith.constant 0 : i32
    return %c0_i32, %c0_i32_0 : i32, i32
  }
  func.func @transform_4(%arg0: i32) -> (i32, i32) {
    %c0_i32 = arith.constant 0 : i32
    %c0_i32_0 = arith.constant 0 : i32
    %c0_i32_1 = arith.constant 0 : i32
    return %c0_i32, %c0_i32_0 : i32, i32
  }
  func.func @transform_5(%arg0: i32) -> (i32, i32) {
    %c0_i32 = arith.constant 0 : i32
    %c0_i32_0 = arith.constant 0 : i32
    %c0_i32_1 = arith.constant 0 : i32
    return %c0_i32, %c0_i32_0 : i32, i32
  }
  func.func @transform_6(%arg0: i32) -> (i32, i32, i32) {
    %c0_i32 = arith.constant 0 : i32
    %c0_i32_0 = arith.constant 0 : i32
    %c0_i32_1 = arith.constant 0 : i32
    return %arg0, %c0_i32, %c0_i32_0 : i32, i32, i32
  }
}

</mosaic_0001>

<bundles_post_ra>
// kernel: tpu_custom_call.1
= control target key start
LH: loop header
LB: loop body
LE: loop exit
PB: predicated region body
PF: predicated region fallthrough
CT: control target
= control target key end

     0   :  { %11 = vsyncpa [#allocation3], 0  ;;  %s1230_s0 = inlined_call_operand.vmem [shape: bf16[4,36,256], index: 0, kind: input, shape index: {}]   ;;  %s1231_s1 = inlined_call_operand.vmem [shape: f32[9,256], index: 1, kind: input, shape index: {}]   ;;  %s1232_s2 = inlined_call_operand.vmem [shape: bf16[8,36], index: 2, kind: input, shape index: {}]   ;;  %s1233_s3 = inlined_call_operand.vmem [shape: bf16[8,4], index: 3, kind: input, shape index: {}]   ;;  %s1234_s4 = inlined_call_operand.vmem [shape: f32[8,9], index: 4, kind: input, shape index: {}]   ;;  %s1235_s5 = inlined_call_operand.vmem [shape: bf16[8,8], index: 5, kind: input, shape index: {}]   ;;  %s1236_s6 = inlined_call_operand.hbm [shape: f32[4,8,256], index: 6, kind: output, shape index: {}]  }
   0x1   :  { %13 = vsyncpa [#allocation3 + $0x1], 0  ;;  %s1003_s21 = smov 0   ;;  %s1005_s22 = smov 0  }
   0x2   :  { %s1007_s23 = smov 0   ;;  %s1009_s24 = smov 0  }
   0x3 LB: > { %s1024_s25 = sadd.s32 4294967295, %s948_s24   ;;  %s781_s26 = sadd.s32 4294967294, %s948_s24   ;;  %s948_s24 = sphi %s1009_s24, %s1242_s24   ;;  %s944_s23 = sphi %s1007_s23, %s1241_s23   ;;  %s940_s22 = sphi %s1005_s22, %s1240_s22   ;;  %s936_s21 = sphi %s1003_s21, %s1239_s21  }
   0x4   : > { %s1028_s27 = sadd.s32 1, %s948_s24   ;;  %s157_s28 = sadd.s32 1, %s944_s23 }
   0x5   : > { %s154_s29 = ssub.s32 %s948_s24, %s1028_s27  ;;  %p167_p0 = scmp.ne.s32.totalorder %s944_s23, %s940_s22 }
   0x6   : > { %p155_p1 = scmp.eq.s32.totalorder %s154_s29, 0  ;;  %p168_p2 = scmp.eq.s32.totalorder %s1024_s25, 3 }
   0x7   : > { %p173_p3 = scmp.ne.s32.totalorder %s940_s22, %s936_s21  ;;  %p174_p4 = scmp.eq.s32.totalorder %s781_s26, 3 }
   0x8   : > { %s1039_s30 = scalar_select %p155_p1, %s944_s23, %s157_s28  }
   0x9   : > { %p1041_p5 = por %p168_p2, %p167_p0  ;;  %p1045_p6 = por %p174_p4, %p173_p3 }
   0xa   : > { %p784_p7 = scmp.ge.s32.totalorder %s948_s24, 1  ;;  %p215_p8 = scmp.lt.s32.totalorder %s948_s24, 5 }
   0xc   : > { %p216_p9 = pnand %p784_p7, %p215_p8 }
   0xd   : > { %p245_p10 = scmp.lt.s32.totalorder (!%p216_p9), %s1024_s25, 3  ;;  %s959_s18 = smov (!%p216_p9), 17  }
   0xe   : > { %219 = sbr.rel (%p216_p9) target bundleno = 1234 (0x4d2), region = 44  ;;  %s960_s19 = smov (!%p216_p9), 16  }
   0xf   : > { %s961_s20 = smov (!%p216_p9), 127   ;;  %s962_s26 = smov (!%p216_p9), 113  }
  0x10   : > { %s963_s28 = smov (!%p216_p9), 15   ;;  %s964_s29 = smov (!%p216_p9), 1  }
  0x11   : > { %s965_s11 = smov (!%p216_p9), 112   ;;  %s966_s12 = smov (!%p216_p9), 111  }
  0x13   : > { %v950_v0 = vmov 0   ;;  %s246_s9 = scalar_select %p245_p10, %s1024_s25, 3  ;;  %vm286_vm0 = vcmask 1041408   ;;  %v256_v11 = vld [vmem:[%s1232_s2] sm:$0xf]  ;;  %vm282_vm1 = vcmask 293888   ;;  %v415_v55 = vlaneseq }
  0x14   : > { %325 = vmatprep.mubr.bf16.mxu0 %v950_v0  ;;  %866 = vset.pattern.permute.xlu1 %v950_v0  ;;  %v406_v17 = vld [vmem:[%s1234_s4] sm:$0xff]  ;;  %v951_v18 = vmov 3   ;;  %v952_v19 = vmov 1   ;;  %v953_v20 = vmov 2   ;;  %v954_v28 = vmov 5  }
  0x15   : > { %379 = vmatprep.mubr.bf16.mxu1 %v950_v0  ;;  %s809_s10 = smul.u32 40, %s246_s9  ;;  %869 = vset.pattern.permute.xlu0 %v951_v18  ;;  %v955_v29 = vmov 6   ;;  %v956_v30 = vmov 4   ;;  %v957_v31 = vmov 7   ;;  %v958_v32 = vmov 8  }
  0x16   : > { %432 = vperm.xlu1 %866, %v406_v17   ;;  %v334_v44 = vld [vmem:[%s1233_s3] sm:$0xf]  ;;  %vm337_vm2 = vcmask 31744   ;;  %v1113_v58 = vshrl.u32 %v415_v55, 7  ;;  %v1117_v60 = vand.u32 127, %v415_v55  ;;  %vm639_vm11 = vcmask 1043456  }
  0x17   : > { %s249_s13 = scalar_lea.vmem %s1230_s0, %s809_s10  ;;  %vm635_vm12 = vcmask 64512   ;;  %s808_s10 = sshll.u32 %s1024_s25, 8 }
  0x18   : > { %v255_v1 = vld [vmem:[%s249_s13 + $0x20] sm:$0x33]  ;;  %v1059_v2 = vld [vmem:[%s249_s13 + $0x10] sm:$0xff]  ;;  %v254_v3 = vld [vmem:[%s249_s13 + $0x18] sm:$0xff]  ;;  %v448_v61 = vsub.s32 1, %v1113_v58  ;;  %v422_v62 = vsub.s32 0, %v1113_v58  ;;  %s1195_s15 = scalar_lea.hbm %s1236_s6, %s808_s10 }
  0x19   : > { %v792_v4 = vcombine.high %v255_v1, %v255_v1  ;;  %v791_v5 = vcombine.low %v255_v1, %v255_v1  ;;  %v790_v6 = vcombine.high %v1059_v2, %v254_v3  ;;  %v789_v8 = vcombine.low %v1059_v2, %v254_v3  ;;  %v879_v9 = vld [vmem:[%s249_s13 + $0x4] ss:$8 sps:$4 sm:$0xff]   ;;  %v881_v10 = vld [vmem:[%s249_s13] ss:$8 sps:$4 sm:$0xff]   ;;  %s967_s25 = smov [#allocation2]  }
  0x1a   : > { %867 = vset.pattern.permute.xlu1 %v952_v19  ;;  %v796_v41 = vcombine.high %v1059_v2, %v1059_v2  ;;  %v795_v42 = vcombine.low %v1059_v2, %v1059_v2  ;;  %vm443_vm3 = vcmp.lt.s32.totalorder %v1117_v60, 16  ;;  %v1126_v1 = vld [vmem:[%s1231_s1] sm:$0xff]  ;;  %v1131_v2 = vld [vmem:[%s1231_s1 + $0x8] sm:$0xff]  ;;  %vm417_vm4 = vcmp.lt.s32.totalorder %v1117_v60, 17 }
  0x1b   : > { %793 = vmatprep.subr.msk.bf16.mxu0 %vm286_vm0, %v792_v4  ;;  %v288_v7 = vsel %vm286_vm0, %v791_v5, 0  ;;  %457 = vperm.xlu1 %867, %v406_v17   ;;  %v449_v4 = vrot.slane %v1126_v1, %v448_v61  ;;  %v453_v5 = vrot.slane %v1131_v2, %v448_v61  ;;  %vm468_vm5 = vcmp.lt.s32.totalorder %v1117_v60, 15 }
  0x1c   : > { %304 = vmatpush1.bf16.msra.mxu0 %v288_v7  ;;  %797 = vmatprep.subr.msk.bf16.mxu1 %vm286_vm0, %v796_v41  ;;  %v342_v43 = vsel %vm286_vm0, %v795_v42, 0  ;;  %v516_v7 = vsub.s32 4, %v1113_v58  ;;  %vm493_vm6 = vcmp.lt.s32.totalorder %v1117_v60, 1  ;;  %vm536_vm7 = vcmp.lt.s32.totalorder %v1117_v60, 127 }
  0x1d   : > { %305 = vmatprep.subr.bf16.mxu0 %v790_v6  ;;  %362 = vmatpush1.bf16.msra.mxu1 %v342_v43  ;;  %v498_v6 = vsub.s32 3, %v1113_v58  ;;  %vm561_vm8 = vcmp.lt.s32.totalorder %v1117_v60, 113  ;;  %vm586_vm9 = vcmp.lt.s32.totalorder %v1117_v60, 112  ;;  %vm611_vm10 = vcmp.lt.s32.totalorder %v1117_v60, 111 }
  0x1f   : > { %868 = vset.pattern.permute.xlu1 %v953_v20 }
  0x20   : > { %306 = vmatpush1.bf16.msra.mxu0 %v789_v8  ;;  %482 = vperm.xlu1 %868, %v406_v17   ;;  %v423_v8 = vrot.slane %v1126_v1, %v422_v62 }
  0x21   : > { %307 = vmatprep.subr.bf16.mxu0 %v879_v9  ;;  %798 = vmatmul.mubr.msk.bf16.vlgmr.msra.gmra.mxu1 %vm337_vm2, %v334_v44 }
  0x22   : > { %678 = vmatprep.mubr.bf16.mxu1 %v950_v0  ;;  %v473_v0 = vsub.s32 2, %v1113_v58 }
  0x24   : > { %308 = vmatpush1.bf16.msra.mxu0 %v881_v10  ;;  %871 = vset.pattern.permute.xlu1 %v954_v28 }
  0x25   : > { %550 = vperm.xlu1 %871, %v406_v17  }
  0x27   : > { %794 = vmatmul.mubr.msk.bf16.vlgmr.msra.gmra.mxu0 %vm282_vm1, %v256_v11 }
  0x29   : > { %872 = vset.pattern.permute.xlu1 %v955_v29 }
  0x2a   : > { %575 = vperm.xlu1 %872, %v406_v17  }
  0x91   : > { %v1101_v45 = vpop.permute.xlu1 %432 }
  0x96   : > { %v458_v46 = vpop.permute.xlu1 %457 }
  0x9b   : > { %v1103_v47 = vpop.permute.xlu1 %482 }
  0xa0   : > { %v1105_v48 = vpop.permute.xlu1 %550 }
  0xa5   : > { %v1107_v49 = vpop.permute.xlu1 %575 }
  0xe7   : > { %v327_v12 = vpop.f32.mrf.mxu0 }
  0xe9   : > { %v329_v13 = vpop.f32.mrf.mxu0 }
  0xea   : > { %v388_v14 = vadd.f32 %v329_v13, %v327_v12 }
  0xeb   : > { %v331_v15 = vpop.f32.mrf.mxu0 }
  0xec   : > { %389 = vadd.xlane.f32.xlu0 %v388_v14  ;;  %v478_v14 = vrot.slane %v1131_v2, %v473_v0 }
  0xed   : > { %v332_v16 = vpop.f32.mrf.mxu0 }
 0x175   : > { %v390_v21 = vpop.xlane.xlu0 %389 }
 0x176   : > { %v391_v22 = vmul.f32 0.00390625, %v390_v21  ;;  %v499_v21 = vrot.slane %v1126_v1, %v498_v6 }
 0x178   : > { %v392_v23 = vsub.f32 %v327_v12, %v391_v22  ;;  %v393_v24 = vsub.f32 %v329_v13, %v391_v22  ;;  %v427_v12 = vrot.slane %v1131_v2, %v422_v62  ;;  %v474_v13 = vrot.slane %v1126_v1, %v473_v0 }
 0x179   : > { %v503_v22 = vrot.slane %v1131_v2, %v498_v6 }
 0x17a   : > { %v394_v25 = vmul.f32 %v392_v23, %v392_v23  ;;  %v395_v26 = vmul.f32 %v393_v24, %v393_v24 }
 0x17c   : > { %v396_v27 = vadd.f32 %v395_v26, %v394_v25 }
 0x17e   : > { %397 = vadd.xlane.f32.xlu0 %v396_v27 }
 0x194   : > { %507 = vperm.xlu0 %869, %v406_v17  }
 0x198   : > { %870 = vset.pattern.permute.xlu0 %v956_v30  ;;  %v517_v30 = vrot.slane %v1126_v1, %v516_v7 }
 0x199   : > { %525 = vperm.xlu0 %870, %v406_v17  }
 0x19d   : > { %873 = vset.pattern.permute.xlu0 %v957_v31  ;;  %v521_v31 = vrot.slane %v1131_v2, %v516_v7 }
 0x19e   : > { %600 = vperm.xlu0 %873, %v406_v17  }
 0x1a2   : > { %874 = vset.pattern.permute.xlu0 %v958_v32 }
 0x207   : > { %v398_v33 = vpop.xlane.xlu0 %397 }
 0x208   : > { %v399_v34 = vmul.f32 0.00390625, %v398_v33 }
 0x20a   : > { %v400_v35 = vadd.f32 1e-05, %v399_v34 }
 0x20c   : > { %884 = vrsqrt.f32 %v400_v35 }
 0x20f   : > { %v1109_v52 = vpop.permute.xlu0 %507 }
 0x214   : > { %v1111_v56 = vpop.permute.xlu0 %525 }
 0x219   : > { %v885_v36 = vpop.eup %884  ;;  %v1115_v59 = vpop.permute.xlu0 %600 }
 0x21a   : > { %v402_v37 = vmul.f32 %v885_v36, %v392_v23  ;;  %v403_v38 = vmul.f32 %v885_v36, %v393_v24 }
 0x21c   : > { %v1071_v39 = vmax.f32 %v402_v37, 0.0  ;;  %v1073_v40 = vmax.f32 %v403_v38, 0.0  ;;  %v541_v37 = vsub.s32 5, %v1113_v58 }
 0x21e   : > { %413 = vrot.lane.b32.xlu1 %v1073_v40, %s959_s18  ;;  %411 = vrot.lane.b32.xlu0 %v1071_v39, %s959_s18  ;;  %v546_v61 = vrot.slane %v1131_v2, %v541_v37  ;;  %s892_s18 = sshll.u32 %s967_s25, 4  ;;  %s893_s18 = int_to_ptr.vmem [resolvable:$false] %s892_s18 }
 0x222   : > { %439 = vrot.lane.b32.xlu1 %v1071_v39, %s960_s19  ;;  %534 = vrot.lane.b32.xlu0 %v1073_v40, %s961_s20 }
 0x226   : > { %441 = vrot.lane.b32.xlu1 %v1073_v40, %s960_s19  ;;  %557 = vrot.lane.b32.xlu0 %v1071_v39, %s962_s26  ;;  %s894_s19 = scalar_lea.vmem %s893_s18, 512 }
 0x22a   : > { %464 = vrot.lane.b32.xlu1 %v1071_v39, %s963_s28  ;;  %625 = vperm.xlu0 %874, %v406_v17  }
 0x22e   : > { %466 = vrot.lane.b32.xlu1 %v1073_v40, %s963_s28 }
 0x232   : > { %489 = vrot.lane.b32.xlu1 %v1071_v39, %s964_s29 }
 0x236   : > { %491 = vrot.lane.b32.xlu1 %v1073_v40, %s964_s29  ;;  %s242_s29 = sand.u32 1, %s940_s22  }
 0x237   : > { %s785_s9 = sshll.u32 %s242_s29, 4  ;;  %s708_s16 = scalar_lea.sflag [#allocation3], %s242_s29 }
 0x23a   : > { %532 = vrot.lane.b32.xlu1 %v1071_v39, %s961_s20 }
 0x23e   : > { %559 = vrot.lane.b32.xlu1 %v1073_v40, %s962_s26 }
 0x242   : > { %582 = vrot.lane.b32.xlu1 %v1071_v39, %s965_s11 }
 0x246   : > { %584 = vrot.lane.b32.xlu1 %v1073_v40, %s965_s11  ;;  %s244_s11 = scalar_lea.vmem [#allocation2], %s785_s9 }
 0x24a   : > { %607 = vrot.lane.b32.xlu1 %v1071_v39, %s966_s12 }
 0x24e   : > { %609 = vrot.lane.b32.xlu1 %v1073_v40, %s966_s12  ;;  %s722_s12 = sshll.u32 %s244_s11, 4  ;;  %s723_s12 = int_to_ptr.vmem [resolvable:$true] %s722_s12 }
 0x24f   : > { %s888_s17 = scalar_lea.vmem %s723_s12, 256  ;;  %p895_p0 = scmp.lt.s32.totalorder %s723_s12, %s893_s18 }
 0x250   : > { %p889_p11 = scmp.ne.s32.totalorder %s723_s12, %s888_s17  ;;  %p896_p1 = scmp.lt.s32.totalorder %s894_s19, %s888_s17 }
 0x252   : > { %p890_p12 = pnand %p889_p11, %p1041_p5  ;;  %p897_p2 = por %p896_p1, %p895_p0 }
 0x254   : > { %p891_p13 = pneg %p890_p12 }
 0x256   : > { %p898_p3 = pnand %p897_p2, %p891_p13 }
 0x290   : > { %v414_v50 = vpop.permute.xlu1 %413  ;;  %v412_v3 = vpop.permute.xlu0 %411 }
 0x291   : > { %v418_v15 = vsel %vm417_vm4, %v412_v3, %v414_v50  ;;  %v419_v16 = vsel %vm417_vm4, %v414_v50, %v412_v3  ;;  %v522_v50 = vmul.f32 %v517_v30, %v1071_v39  ;;  %v591_v39 = vsub.s32 7, %v1113_v58 }
 0x292   : > { %v428_v26 = vmul.f32 %v423_v8, %v419_v16  ;;  %v429_v27 = vmul.f32 %v427_v12, %v418_v15 }
 0x294   : > { %v440_v51 = vpop.permute.xlu1 %439  ;;  %v535_v36 = vpop.permute.xlu0 %534  ;;  %v435_v41 = vmul.f32 %v1101_v45, %v428_v26  ;;  %v436_v42 = vmul.f32 %v1101_v45, %v429_v27  ;;  %v542_v45 = vrot.slane %v1126_v1, %v541_v37  ;;  %v800_v26 = vld [vmem:[%s1231_s1 + $0x18] ss:$0 sm:$0xff] }
 0x298   : > { %v442_v53 = vpop.permute.xlu1 %441  ;;  %v558_v3 = vpop.permute.xlu0 %557 }
 0x299   : > { %v444_v9 = vsel %vm443_vm3, %v440_v51, %v442_v53  ;;  %v445_v10 = vsel %vm443_vm3, %v442_v53, %v440_v51  ;;  %v523_v51 = vmul.f32 %v521_v31, %v1073_v40 }
 0x29a   : > { %v454_v19 = vmul.f32 %v449_v4, %v445_v10  ;;  %v455_v20 = vmul.f32 %v453_v5, %v444_v9 }
 0x29c   : > { %v465_v54 = vpop.permute.xlu1 %464  ;;  %v460_v32 = vmul.f32 %v458_v46, %v454_v19  ;;  %v461_v33 = vmul.f32 %v458_v46, %v455_v20  ;;  %v566_v46 = vsub.s32 6, %v1113_v58  ;;  %v596_v58 = vrot.slane %v1131_v2, %v591_v39 }
 0x29e   : > { %v462_v53 = vadd.f32 %v460_v32, %v435_v41  ;;  %v567_v4 = vrot.slane %v1126_v1, %v566_v46  ;;  %v571_v5 = vrot.slane %v1131_v2, %v566_v46  ;;  %v381_v46 = vpop.f32.mrf.mxu1 }
 0x2a0   : > { %v467_v57 = vpop.permute.xlu1 %466 }
 0x2a1   : > { %v469_v17 = vsel %vm468_vm5, %v465_v54, %v467_v57  ;;  %v470_v18 = vsel %vm468_vm5, %v467_v57, %v465_v54  ;;  %v463_v54 = vadd.f32 %v461_v33, %v436_v42 }
 0x2a2   : > { %v479_v28 = vmul.f32 %v474_v13, %v470_v18  ;;  %v480_v29 = vmul.f32 %v478_v14, %v469_v17  ;;  %v528_v13 = vmul.f32 %v1111_v56, %v522_v50  ;;  %v529_v14 = vmul.f32 %v1111_v56, %v523_v51  ;;  %v799_v56 = vld [vmem:[%s1231_s1 + $0x10] ss:$0 sm:$0xff] }
 0x2a4   : > { %v490_v63 = vpop.permute.xlu1 %489  ;;  %v485_v43 = vmul.f32 %v1103_v47, %v479_v28  ;;  %v486_v44 = vmul.f32 %v1103_v47, %v480_v29 }
 0x2a6   : > { %v487_v40 = vadd.f32 %v485_v43, %v462_v53  ;;  %v488_v62 = vadd.f32 %v486_v44, %v463_v54  ;;  %v383_v53 = vpop.f32.mrf.mxu1 }
 0x2a8   : > { %v492_v11 = vpop.permute.xlu1 %491  ;;  %v385_v54 = vpop.f32.mrf.mxu1 }
 0x2a9   : > { %v494_v23 = vsel %vm493_vm6, %v490_v63, %v492_v11  ;;  %v495_v24 = vsel %vm493_vm6, %v492_v11, %v490_v63  ;;  %v592_v11 = vrot.slane %v1126_v1, %v591_v39 }
 0x2aa   : > { %v504_v34 = vmul.f32 %v499_v21, %v495_v24  ;;  %v505_v35 = vmul.f32 %v503_v22, %v494_v23 }
 0x2ac   : > { %v533_v25 = vpop.permute.xlu1 %532  ;;  %v510_v55 = vmul.f32 %v1109_v52, %v504_v34  ;;  %v511_v57 = vmul.f32 %v1109_v52, %v505_v35 }
 0x2ad   : > { %v537_v63 = vsel %vm536_vm7, %v533_v25, %v535_v36  ;;  %v538_v0 = vsel %vm536_vm7, %v535_v36, %v533_v25 }
 0x2ae   : > { %v512_v52 = vadd.f32 %v510_v55, %v487_v40  ;;  %v513_v6 = vadd.f32 %v511_v57, %v488_v62  ;;  %v547_v9 = vmul.f32 %v542_v45, %v537_v63  ;;  %v548_v10 = vmul.f32 %v546_v61, %v538_v0  ;;  %v386_v55 = vpop.f32.mrf.mxu1 }
 0x2b0   : > { %v560_v38 = vpop.permute.xlu1 %559  ;;  %v530_v19 = vadd.f32 %v528_v13, %v512_v52  ;;  %v531_v20 = vadd.f32 %v529_v14, %v513_v6  ;;  %v553_v21 = vmul.f32 %v1105_v48, %v547_v9  ;;  %v554_v22 = vmul.f32 %v1105_v48, %v548_v10 }
 0x2b1   : > { %v562_v7 = vsel %vm561_vm8, %v558_v3, %v560_v38  ;;  %v563_v8 = vsel %vm561_vm8, %v560_v38, %v558_v3 }
 0x2b2   : > { %v572_v17 = vmul.f32 %v567_v4, %v562_v7  ;;  %v573_v18 = vmul.f32 %v571_v5, %v563_v8  ;;  %v555_v27 = vadd.f32 %v553_v21, %v530_v19  ;;  %v556_v28 = vadd.f32 %v554_v22, %v531_v20 }
 0x2b4   : > { %v583_v47 = vpop.permute.xlu1 %582  ;;  %v578_v2 = vmul.f32 %v1107_v49, %v572_v17  ;;  %v579_v25 = vmul.f32 %v1107_v49, %v573_v18  ;;  %v626_v49 = vpop.permute.xlu0 %625 }
 0x2b6   : > { %v580_v33 = vadd.f32 %v578_v2, %v555_v27  ;;  %v581_v60 = vadd.f32 %v579_v25, %v556_v28 }
 0x2b8   : > { %v585_v12 = vpop.permute.xlu1 %584 }
 0x2b9   : > { %v587_v15 = vsel %vm586_vm9, %v583_v47, %v585_v12  ;;  %v588_v16 = vsel %vm586_vm9, %v585_v12, %v583_v47 }
 0x2ba   : > { %v597_v23 = vmul.f32 %v592_v11, %v587_v15  ;;  %v598_v24 = vmul.f32 %v596_v58, %v588_v16 }
 0x2bc   : > { %v608_v1 = vpop.permute.xlu1 %607  ;;  %v603_v48 = vmul.f32 %v1115_v59, %v597_v23  ;;  %v604_v29 = vmul.f32 %v1115_v59, %v598_v24  ;;  %v632_v59 = vld [vmem:[%s1235_s5] sm:$0xf] }
 0x2be   : > { %v605_v36 = vadd.f32 %v603_v48, %v580_v33  ;;  %v606_v37 = vadd.f32 %v604_v29, %v581_v60 }
 0x2c0   : > { %v610_v30 = vpop.permute.xlu1 %609 }
 0x2c1   : > { %v612_v31 = vsel %vm611_vm10, %v608_v1, %v610_v30  ;;  %v613_v32 = vsel %vm611_vm10, %v610_v30, %v608_v1 }
 0x2c2   : > { %v622_v34 = vmul.f32 %v799_v56, %v612_v31  ;;  %v623_v35 = vmul.f32 %v800_v26, %v613_v32 }
 0x2c4   : > { %v628_v38 = vmul.f32 %v626_v49, %v622_v34  ;;  %v629_v41 = vmul.f32 %v626_v49, %v623_v35 }
 0x2c6   : > { %v630_v42 = vadd.f32 %v628_v38, %v605_v36  ;;  %v631_v43 = vadd.f32 %v629_v41, %v606_v37 }
 0x2c8   : > { %v633_v44 = vpack.c.bf16 %v630_v42, %v630_v42  ;;  %v634_v50 = vpack.c.bf16 %v631_v43, %v631_v43 }
 0x2ca   : > { %801 = vmatprep.subr.msk.bf16.mxu1 %vm639_vm11, %v634_v50  ;;  %v641_v51 = vsel %vm639_vm11, %v633_v44, 0 }
 0x2cb   : > { %661 = vmatpush1.bf16.msra.mxu1 %v641_v51 }
 0x2ce   : > { %802 = vmatmul.mubr.msk.bf16.vlgmr.msra.gmra.mxu1 %vm635_vm12, %v632_v59 }
 0x38e   : > { %v680_v57 = vpop.f32.mrf.mxu1 }
 0x390   : > { %v682_v45 = vpop.f32.mrf.mxu1 }
 0x391   : > { %v687_v61 = vadd.f32 %v682_v45, %v680_v57 }
 0x392   : > { %v684_v47 = vpop.f32.mrf.mxu1 }
 0x393   : > { %688 = vadd.xlane.f32.xlu0 %v687_v61 }
 0x394   : > { %v685_v39 = vpop.f32.mrf.mxu1 }
 0x41c   : > { %v689_v40 = vpop.xlane.xlu0 %688 }
 0x41d   : > { %v690_v62 = vmul.f32 0.00390625, %v689_v40 }
 0x41f   : > { %v691_v63 = vsub.f32 %v680_v57, %v690_v62  ;;  %v692_v0 = vsub.f32 %v682_v45, %v690_v62 }
 0x421   : > { %v693_v3 = vmul.f32 %v691_v63, %v691_v63  ;;  %v694_v4 = vmul.f32 %v692_v0, %v692_v0 }
 0x423   : > { %v695_v5 = vadd.f32 %v694_v4, %v693_v3 }
 0x425   : > { %696 = vadd.xlane.f32.xlu1 %v695_v5 }
 0x4ae   : > { %v697_v52 = vpop.xlane.xlu1 %696 }
 0x4af   : > { %v698_v6 = vmul.f32 0.00390625, %v697_v52 }
 0x4b1   : > { %v699_v7 = vadd.f32 1e-05, %v698_v6 }
 0x4b3   : > { %886 = vrsqrt.f32 %v699_v7 }
 0x4c0   : > { %v887_v8 = vpop.eup %886 }
 0x4c1   : > { %v701_v9 = vmul.f32 %v887_v8, %v691_v63  ;;  %v702_v10 = vmul.f32 %v887_v8, %v692_v0 }
 0x4c3   : > { %v703_v11 = vadd.f32 %v701_v9, %v381_v46  ;;  %v704_v58 = vadd.f32 %v702_v10, %v383_v53 }
 0x4c5   : > { %705 = vst [vmem:[%s244_s11] sm:$0xff] %v703_v11  ;;  %706 = vst [vmem:[%s244_s11 + $0x8] sm:$0xff] %v704_v58 }
 0x4c6   : > { %901 = shalt.err (!%p898_p3)
}
 0x4c7   : > { %s902_s20 = scalar_lea.hbm %s1195_s15, 256  ;;  %s906_s29 = scalar_lea.hbm %s1236_s6, 1024 }
 0x4c8   : > { %p903_p4 = scmp.ne.s32.totalorder %s1195_s15, %s902_s20  ;;  %p907_p9 = scmp.lt.s32.totalorder %s1195_s15, %s1236_s6 }
 0x4c9   : > { %p908_p10 = scmp.lt.s32.totalorder %s906_s29, %s902_s20 }
 0x4ca   : > { %p904_p7 = pnand %p903_p4, %p1041_p5 }
 0x4cb   : > { %p909_p11 = por %p908_p10, %p907_p9 }
 0x4cc   : > { %p905_p8 = pneg %p904_p7 }
 0x4ce   : > { %p910_p12 = pnand %p909_p11, %p905_p8 }
 0x4d0   : > { %913 = shalt.err (!%p910_p12)
}
 0x4d1   : > { %810 = dma.vmem_to_hbm [thread:$0]  (%p1041_p5), %s723_s12, 256, %s1195_s15, %s708_s16  }
 0x4d2 PF: > { %p816_p13 = scmp.ge.s32.totalorder %s948_s24, 2  ;;  %s734_s11 = sand.u32 1, %s936_s21  }
 0x4d3   : > { %s735_s13 = scalar_lea.sflag [#allocation3], %s734_s11 }
 0x4d4   : > { %p813_p0 = pnand %p816_p13, %p1045_p6 }
 0x4d6   : > { %p814_p1 = pneg %p813_p0 }
 0x4d8   : > { %931 = dma.done.wait (%p814_p1), %s735_s13, 256  }
 0x4d9   : > { %933 = vsyncadd (%p814_p1), %s735_s13, 4294967040  ;;  %p16_p2 = scmp.ge.s32.totalorder %s1028_s27, 6   ;;  %s1239_s21 = smov %s940_s22 }
 0x4da   : > { %s1240_s22 = smov %s944_s23  ;;  %s1241_s23 = smov %s1039_s30 }
 0x4db   : > { %s1242_s24 = smov %s1028_s27  ;;  %18 = sbr.rel (!%p16_p2) target bundleno = 3 (0x3), region = 79 }
 0x4e0   :  { %740 = vsyncpa [#allocation3], 1 }
 0x4e1   :  { %742 = vsyncpa [#allocation3 + $0x1], 1 }

</bundles_post_ra>
